<compile_context>
chip_gen: v5e
topology: v5e:2x2
jax: 0.10.0
libtpu: 0.0.40
codegen_flags: <defaults>
</compile_context>

<pallas_src>
import functools
import re

import jax
import jax.numpy as jnp
from jax.experimental import pallas as pl
from jax.experimental.pallas import tpu as pltpu

_LANES = 128
_SUBLANES = 8                        # f32 vreg sublanes (accumulator fold)
_SUBLANE_PACK = 32                   # worst-case dtype packing (int8/fp8)
_MIN_TILE = _LANES * _SUBLANE_PACK   # 4096 elements
_VMEM_LIMIT_BYTES = 48 * 1024 * 1024


# --------------------------------------------------------------------------
# Chip-generation aware defaults
# --------------------------------------------------------------------------
@functools.lru_cache(maxsize=None)
def _chip_config():
    """Returns (default_block_rows, default_num_slices, want_core_parallel)."""
    gen = 0
    try:
        kind = jax.devices()[0].device_kind.lower()
        m = re.search(r"(\d+)", kind)
        if m:
            gen = int(m.group(1))
    except Exception:
        gen = 0
    if gen >= 7:      # v7x: 2 TensorCores, 64 MiB VMEM, ~3.2 TB/s HBM
        return 8192, 2, True
    if gen == 6:      # v6e: 1 TC, 128 MiB VMEM, ~1.4 TB/s HBM
        return 8192, 1, False
    return 4096, 1, False   # v5e / unknown: conservative


def _reduce_semantics(use_core_parallel):
    if use_core_parallel:
        cp = getattr(pltpu, "CORE_PARALLEL", None)
        arb = getattr(pltpu, "ARBITRARY", "arbitrary")
        if cp is not None:
            return (cp, arb)
    return ("parallel", "arbitrary")


def _compiler_params(dim_semantics):
    return pltpu.CompilerParams(dimension_semantics=dim_semantics,
                                vmem_limit_bytes=_VMEM_LIMIT_BYTES)


# --------------------------------------------------------------------------
# Kernels
# --------------------------------------------------------------------------
def _make_wmse_reduce_kernel(rows, block_rows, steps_per_slice, first_masked_step):
    """sum((x-t)^2 * w) and sum(w); mask only on tail / replay steps."""

    def _accum(x_ref, t_ref, w_ref, ssq_acc, sw_acc, mask):
        w = w_ref[...].astype(jnp.float32)
        d = x_ref[...].astype(jnp.float32) - t_ref[...].astype(jnp.float32)
        sq = d * d * w
        if mask is not None:
            # jnp.where (not a 0/1 multiply): out-of-bounds block regions may
            # hold garbage (NaN/Inf) and must never touch the accumulators.
            sq = jnp.where(mask, sq, 0.0)
            w = jnp.where(mask, w, 0.0)
        ssq_acc[...] += sq.reshape(-1, _SUBLANES, _LANES).sum(axis=0)
        sw_acc[...] += w.reshape(-1, _SUBLANES, _LANES).sum(axis=0)

    def kernel(x_ref, t_ref, w_ref, ssq_ref, sw_ref, ssq_acc, sw_acc):
        i = pl.program_id(1)

        @pl.when(i == 0)
        def _init():
            ssq_acc[...] = jnp.zeros_like(ssq_acc)
            sw_acc[...] = jnp.zeros_like(sw_acc)

        if first_masked_step is None:
            _accum(x_ref, t_ref, w_ref, ssq_acc, sw_acc, None)
        else:
            gstep = pl.program_id(0) * steps_per_slice + i

            @pl.when(gstep < first_masked_step)
            def _fast():
                _accum(x_ref, t_ref, w_ref, ssq_acc, sw_acc, None)

            @pl.when(gstep >= first_masked_step)
            def _tail():
                rid = (jax.lax.broadcasted_iota(jnp.int32, (block_rows, _LANES), 0)
                       + gstep * block_rows)
                _accum(x_ref, t_ref, w_ref, ssq_acc, sw_acc, rid < rows)

        @pl.when(i == pl.num_programs(1) - 1)
        def _finalize():
            ssq_ref[...] = jnp.sum(ssq_acc[...]).reshape(1, 1, 1)
            sw_ref[...] = jnp.sum(sw_acc[...]).reshape(1, 1, 1)

    return kernel


def _make_l1_reduce_kernel(rows, block_rows, steps_per_slice, first_masked_step):
    """sum(|x - t|) (weight=None -> F.l1_loss fallback)."""

    def _accum(x_ref, t_ref, acc, mask):
        a = jnp.abs(x_ref[...].astype(jnp.float32) - t_ref[...].astype(jnp.float32))
        if mask is not None:
            a = jnp.where(mask, a, 0.0)
        acc[...] += a.reshape(-1, _SUBLANES, _LANES).sum(axis=0)

    def kernel(x_ref, t_ref, sabs_ref, acc):
        i = pl.program_id(1)

        @pl.when(i == 0)
        def _init():
            acc[...] = jnp.zeros_like(acc)

        if first_masked_step is None:
            _accum(x_ref, t_ref, acc, None)
        else:
            gstep = pl.program_id(0) * steps_per_slice + i

            @pl.when(gstep < first_masked_step)
            def _fast():
                _accum(x_ref, t_ref, acc, None)

            @pl.when(gstep >= first_masked_step)
            def _tail():
                rid = (jax.lax.broadcasted_iota(jnp.int32, (block_rows, _LANES), 0)
                       + gstep * block_rows)
                _accum(x_ref, t_ref, acc, rid < rows)

        @pl.when(i == pl.num_programs(1) - 1)
        def _finalize():
            sabs_ref[...] = jnp.sum(acc[...]).reshape(1, 1, 1)

    return kernel


def _wmse_elementwise_kernel(x_ref, t_ref, w_ref, o_ref):
    """reduction='none': per-element (x-t)^2 * w."""
    d = x_ref[...].astype(jnp.float32) - t_ref[...].astype(jnp.float32)
    o_ref[...] = (d * d * w_ref[...].astype(jnp.float32)).astype(o_ref.dtype)


def _l1_elementwise_kernel(x_ref, t_ref, o_ref):
    """reduction='none', weight=None: per-element |x - t|."""
    d = x_ref[...].astype(jnp.float32) - t_ref[...].astype(jnp.float32)
    o_ref[...] = jnp.abs(d).astype(o_ref.dtype)


# --------------------------------------------------------------------------
# Glue (plain JAX, copy-free when already 32*128 aligned)
# --------------------------------------------------------------------------
def _flatten_lanes(arr):
    """Flatten to a lane-dense [rows, 128] slab with rows % 32 == 0 (so bf16 /
    int8 / fp8 packed layouts lower too).  Pads with zeros only when needed;
    the zeros contribute exactly 0 to every sum."""
    flat = jnp.ravel(arr)
    n = flat.shape[0]
    n_pad = -(-n // _MIN_TILE) * _MIN_TILE
    if n_pad != n:
        flat = jnp.pad(flat, (0, n_pad - n))
    return flat.reshape(n_pad // _LANES, _LANES), n


def _block_rows_for(rows, max_block_rows):
    br = (min(max_block_rows, rows) // _SUBLANE_PACK) * _SUBLANE_PACK
    return max(_SUBLANE_PACK, br)


def _reduce_geometry(rows, max_block_rows, num_slices):
    block_rows = _block_rows_for(rows, max_block_rows)
    steps = -(-rows // block_rows)
    num_slices = num_slices if steps >= num_slices else 1
    steps_per_slice = -(-steps // num_slices)
    total_steps = num_slices * steps_per_slice
    if rows % block_rows != 0:
        first_masked = steps - 1        # partial tail block (garbage region)
    elif total_steps > steps:
        first_masked = steps            # clamped replay step(s) only
    else:
        first_masked = None             # fully aligned: no mask path compiled
    return block_rows, steps, num_slices, steps_per_slice, first_masked


def _wmse_sums(x2, t2, w2, max_block_rows, num_slices, core_parallel):
    rows = x2.shape[0]
    block_rows, steps, num_slices, sps, first_masked = _reduce_geometry(
        rows, max_block_rows, num_slices)
    kernel = _make_wmse_reduce_kernel(rows, block_rows, sps, first_masked)
    in_spec = pl.BlockSpec(
        (block_rows, _LANES),
        lambda c, i: (jnp.minimum(c * sps + i, steps - 1), 0))
    out_spec = pl.BlockSpec((1, 1, 1), lambda c, i: (c, 0, 0))
    ssq, sw = pl.pallas_call(
        kernel,
        out_shape=(jax.ShapeDtypeStruct((num_slices, 1, 1), jnp.float32),
                   jax.ShapeDtypeStruct((num_slices, 1, 1), jnp.float32)),
        grid_spec=pltpu.PrefetchScalarGridSpec(
            num_scalar_prefetch=0,
            grid=(num_slices, sps),
            in_specs=[in_spec, in_spec, in_spec],
            out_specs=[out_spec, out_spec],
            scratch_shapes=[pltpu.VMEM((_SUBLANES, _LANES), jnp.float32),
                            pltpu.VMEM((_SUBLANES, _LANES), jnp.float32)]),
        compiler_params=_compiler_params(
            _reduce_semantics(core_parallel and num_slices > 1)),
    )(x2, t2, w2)
    return jnp.sum(ssq), jnp.sum(sw)


def _l1_sum(x2, t2, max_block_rows, num_slices, core_parallel):
    rows = x2.shape[0]
    block_rows, steps, num_slices, sps, first_masked = _reduce_geometry(
        rows, max_block_rows, num_slices)
    kernel = _make_l1_reduce_kernel(rows, block_rows, sps, first_masked)
    in_spec = pl.BlockSpec(
        (block_rows, _LANES),
        lambda c, i: (jnp.minimum(c * sps + i, steps - 1), 0))
    out_spec = pl.BlockSpec((1, 1, 1), lambda c, i: (c, 0, 0))
    sabs = pl.pallas_call(
        kernel,
        out_shape=jax.ShapeDtypeStruct((num_slices, 1, 1), jnp.float32),
        grid_spec=pltpu.PrefetchScalarGridSpec(
            num_scalar_prefetch=0,
            grid=(num_slices, sps),
            in_specs=[in_spec, in_spec],
            out_specs=out_spec,
            scratch_shapes=[pltpu.VMEM((_SUBLANES, _LANES), jnp.float32)]),
        compiler_params=_compiler_params(
            _reduce_semantics(core_parallel and num_slices > 1)),
    )(x2, t2)
    return jnp.sum(sabs)


def _elementwise(kernel, arrays, out_dtype, max_block_rows):
    rows = arrays[0].shape[0]
    block_rows = _block_rows_for(rows, max_block_rows)
    steps = -(-rows // block_rows)
    spec = pl.BlockSpec((block_rows, _LANES), lambda i: (i, 0))
    # Note: out-of-bounds region of a partial last block is computed on
    # (possibly garbage) inputs but Pallas only writes back the valid region.
    return pl.pallas_call(
        kernel,
        out_shape=jax.ShapeDtypeStruct((rows, _LANES), out_dtype),
        grid_spec=pltpu.PrefetchScalarGridSpec(
            num_scalar_prefetch=0,
            grid=(steps,),
            in_specs=[spec] * len(arrays),
            out_specs=spec),
        compiler_params=_compiler_params(("parallel",)),
    )(*arrays)


def _unflatten(out2d, n, shape):
    flat = out2d.reshape(-1)
    if flat.shape[0] != n:          # skip the slice copy when already aligned
        flat = flat[:n]
    return flat.reshape(shape)


# --------------------------------------------------------------------------
# Public wrapper mirroring WeightedMSELoss.forward
# --------------------------------------------------------------------------
@functools.partial(
    jax.jit,
    static_argnames=("reduction", "weight_is_none", "block_rows", "num_slices",
                     "core_parallel"))
def _weighted_mse_impl(x, t, w, reduction, weight_is_none, block_rows,
                       num_slices, core_parallel):
    x2, n = _flatten_lanes(x)
    t2, _ = _flatten_lanes(t)

    if weight_is_none:
        # PyTorch module falls back to F.l1_loss(input, target, reduction=...)
        if reduction == "none":
            out_dtype = jnp.result_type(x.dtype, t.dtype)
            out = _elementwise(_l1_elementwise_kernel, (x2, t2), out_dtype,
                               block_rows)
            return _unflatten(out, n, x.shape)
        sabs = _l1_sum(x2, t2, block_rows, num_slices, core_parallel)
        if reduction == "mean":
            return sabs / jnp.float32(n)
        return sabs

    # TODO(synk): the host-side warnings.warn on mismatched input/target/weight
    # sizes is not replicated (shapes are required to match here).
    w2, _ = _flatten_lanes(w)

    if reduction == "none":
        out_dtype = jnp.result_type(x.dtype, t.dtype, w.dtype)
        out = _elementwise(_wmse_elementwise_kernel, (x2, t2, w2), out_dtype,
                           block_rows)
        return _unflatten(out, n, x.shape)

    ssq, sw = _wmse_sums(x2, t2, w2, block_rows, num_slices, core_parallel)
    if reduction == "mean":
        return ssq / sw
    return ssq


def weighted_mse_loss(input, target, weight, reduction="mean", *,
                      block_rows=None, num_slices=None):
    """JAX/Pallas equivalent of WeightedMSELoss(reduction)(input, target, weight).

    Streaming / HBM-bandwidth bound: passing bf16 inputs halves the HBM bytes
    (accumulation stays f32 inside the kernel).
    """
    d_br, d_ns, d_cp = _chip_config()
    br = int(block_rows) if block_rows is not None else d_br
    ns = int(num_slices) if num_slices is not None else d_ns
    cp = bool(d_cp and ns > 1)
    try:
        return _weighted_mse_impl(input, target, weight, reduction,
                                  weight is None, br, ns, cp)
    except Exception:
        # Guarded fallback: if the core-parallel / 2-slice lowering is rejected
        # on this chip, retry with a plain single-slice serial reduction grid.
        if cp or ns > 1:
            return _weighted_mse_impl(input, target, weight, reduction,
                                      weight is None, br, 1, False)
        raise


# --------------------------------------------------------------------------
# Main
# --------------------------------------------------------------------------
if __name__ == "__main__":
    key = jax.random.PRNGKey(0)
    k1, k2, k3 = jax.random.split(key, 3)

    shape = (2, 4, 16, 16)  # small NCHW-like shape; loss is layout-agnostic
    x = jax.random.normal(k1, shape, dtype=jnp.float32)
    t = jax.random.normal(k2, shape, dtype=jnp.float32)
    w = jax.random.uniform(k3, shape, dtype=jnp.float32)

    # reduction='mean' (default)
    loss_mean = weighted_mse_loss(x, t, w, reduction="mean")
    jax.block_until_ready(loss_mean)
    ref_mean = jnp.sum((x - t) ** 2 * w) / jnp.sum(w)
    assert jnp.allclose(loss_mean, ref_mean, rtol=1e-5, atol=1e-5)

    # reduction='sum'
    loss_sum = weighted_mse_loss(x, t, w, reduction="sum")
    jax.block_until_ready(loss_sum)
    ref_sum = jnp.sum((x - t) ** 2 * w)
    assert jnp.allclose(loss_sum, ref_sum, rtol=1e-5, atol=1e-4)

    # reduction='none'
    loss_none = weighted_mse_loss(x, t, w, reduction="none")
    jax.block_until_ready(loss_none)
    ref_none = (x - t) ** 2 * w
    assert loss_none.shape == shape
    assert jnp.allclose(loss_none, ref_none, rtol=1e-5, atol=1e-6)

    # weight=None -> F.l1_loss fallback ('mean' and 'none')
    loss_l1 = weighted_mse_loss(x, t, None, reduction="mean")
    jax.block_until_ready(loss_l1)
    assert jnp.allclose(loss_l1, jnp.mean(jnp.abs(x - t)), rtol=1e-5, atol=1e-5)

    loss_l1_none = weighted_mse_loss(x, t, None, reduction="none")
    jax.block_until_ready(loss_l1_none)
    assert jnp.allclose(loss_l1_none, jnp.abs(x - t), rtol=1e-5, atol=1e-6)

    # bf16 inputs: half the HBM bytes, f32 accumulation inside the kernel,
    # also exercises the 32-row sublane-packing alignment.
    xb, tb, wb = (a.astype(jnp.bfloat16) for a in (x, t, w))
    loss_bf16 = weighted_mse_loss(xb, tb, wb, reduction="mean")
    jax.block_until_ready(loss_bf16)
    xf, tf, wf = (a.astype(jnp.float32) for a in (xb, tb, wb))
    ref_bf16 = jnp.sum((xf - tf) ** 2 * wf) / jnp.sum(wf)
    assert jnp.allclose(loss_bf16, ref_bf16, rtol=1e-4, atol=1e-4)

    # Stress configs exercising: zero-pad path, partial-tail masked step,
    # clamped replay step, and the 2-slice reduction grid (forced via tiny
    # block_rows / num_slices overrides so shapes stay small).
    stress_cases = [
        ((3, 130, 257), 64, 2),   # partial tail block + replay step, 2 slices
        ((2, 5, 300), 32, 1),     # ragged pad path, single step
        ((2, 3, 50, 9), 32, 2),   # multi-dim, slice count collapses to 1
    ]
    for stress_shape, br, ns in stress_cases:
        ks = jax.random.split(jax.random.PRNGKey(1), 3)
        xs = jax.random.normal(ks[0], stress_shape, dtype=jnp.float32)
        ts = jax.random.normal(ks[1], stress_shape, dtype=jnp.float32)
        ws = jax.random.uniform(ks[2], stress_shape, dtype=jnp.float32)

        got = weighted_mse_loss(xs, ts, ws, reduction="mean",
                                block_rows=br, num_slices=ns)
        want = jnp.sum((xs - ts) ** 2 * ws) / jnp.sum(ws)
        assert jnp.allclose(got, want, rtol=1e-5, atol=1e-5), (stress_shape, br)

        got_n = weighted_mse_loss(xs, ts, ws, reduction="none",
                                  block_rows=br, num_slices=ns)
        assert got_n.shape == stress_shape
        assert jnp.allclose(got_n, (xs - ts) ** 2 * ws, rtol=1e-5, atol=1e-6)

        got_l1 = weighted_mse_loss(xs, ts, None, reduction="sum",
                                   block_rows=br, num_slices=ns)
        assert jnp.allclose(got_l1, jnp.sum(jnp.abs(xs - ts)),
                            rtol=1e-5, atol=1e-4)

    print("KERNEL_OK")
</pallas_src>

<mosaic_0001>
module attributes {stable_mosaic.version = 11 : i64} {
  func.func @kernel(%arg0: i32, %arg1: i32, %arg2: memref<32x128xf32, #tpu.memory_space<vmem>>, %arg3: memref<32x128xf32, #tpu.memory_space<vmem>>, %arg4: memref<32x128xf32, #tpu.memory_space<vmem>>, %arg5: memref<1x1x1xf32, #tpu.memory_space<vmem>>, %arg6: memref<1x1x1xf32, #tpu.memory_space<vmem>>, %arg7: memref<8x128xf32, #tpu.memory_space<vmem>>, %arg8: memref<8x128xf32, #tpu.memory_space<vmem>>) attributes {dimension_semantics = [#tpu.dimension_semantics<parallel>, #tpu.dimension_semantics<arbitrary>], iteration_bounds = array<i64: 1, 1>, scalar_prefetch = 0 : i64, scratch_operands = 2 : i64, tpu.core_type = #tpu.core_type<tc>, window_params = [{transform_indices = @transform_0, window_bounds = array<i64: 32, 128>}, {transform_indices = @transform_1, window_bounds = array<i64: 32, 128>}, {transform_indices = @transform_2, window_bounds = array<i64: 32, 128>}, {transform_indices = @transform_3, window_bounds = array<i64: 1, 1, 1>}, {transform_indices = @transform_4, window_bounds = array<i64: 1, 1, 1>}]} {
    %c0_i32 = arith.constant 0 : i32
    %0 = arith.cmpi eq, %arg1, %c0_i32 : i32
    %1 = arith.extui %0 : i1 to i32
    %c0_i32_0 = arith.constant 0 : i32
    %2 = arith.cmpi ne, %1, %c0_i32_0 : i32
    scf.if %2 {
      %cst_17 = arith.constant 0.000000e+00 : f32
      %22 = vector.broadcast %cst_17 : f32 to vector<8x128xf32>
      %c0_18 = arith.constant 0 : index
      %c0_19 = arith.constant 0 : index
      %23 = vector.load %arg7[%c0_18, %c0_19] : memref<8x128xf32, #tpu.memory_space<vmem>>, vector<8x128xf32>
      tpu.vector_store %arg7[%c0_18, %c0_19], %22 {strides = array<i32>} : memref<8x128xf32, #tpu.memory_space<vmem>>, vector<8x128xf32>,
      %cst_20 = arith.constant 0.000000e+00 : f32
      %24 = vector.broadcast %cst_20 : f32 to vector<8x128xf32>
      %c0_21 = arith.constant 0 : index
      %c0_22 = arith.constant 0 : index
      %25 = vector.load %arg8[%c0_21, %c0_22] : memref<8x128xf32, #tpu.memory_space<vmem>>, vector<8x128xf32>
      tpu.vector_store %arg8[%c0_21, %c0_22], %24 {strides = array<i32>} : memref<8x128xf32, #tpu.memory_space<vmem>>, vector<8x128xf32>,
    } else {
    }
    %c0 = arith.constant 0 : index
    %c0_1 = arith.constant 0 : index
    %3 = vector.load %arg4[%c0, %c0_1] : memref<32x128xf32, #tpu.memory_space<vmem>>, vector<32x128xf32>
    %c0_2 = arith.constant 0 : index
    %c0_3 = arith.constant 0 : index
    %4 = vector.load %arg2[%c0_2, %c0_3] : memref<32x128xf32, #tpu.memory_space<vmem>>, vector<32x128xf32>
    %c0_4 = arith.constant 0 : index
    %c0_5 = arith.constant 0 : index
    %5 = vector.load %arg3[%c0_4, %c0_5] : memref<32x128xf32, #tpu.memory_space<vmem>>, vector<32x128xf32>
    %6 = arith.subf %4, %5 : vector<32x128xf32>
    %7 = arith.mulf %6, %6 : vector<32x128xf32>
    %8 = arith.mulf %7, %3 : vector<32x128xf32>
    %c0_6 = arith.constant 0 : index
    %c0_7 = arith.constant 0 : index
    %9 = vector.load %arg7[%c0_6, %c0_7] : memref<8x128xf32, #tpu.memory_space<vmem>>, vector<8x128xf32>
    %10 = vector.shape_cast %8 : vector<32x128xf32> to vector<4x8x128xf32>
    %cst = arith.constant dense<0.000000e+00> : vector<8x128xf32>
    %11 = vector.multi_reduction <add>, %10, %cst [0] : vector<4x8x128xf32> to vector<8x128xf32>
    %12 = arith.addf %9, %11 : vector<8x128xf32>
    %c0_8 = arith.constant 0 : index
    %c0_9 = arith.constant 0 : index
    %13 = vector.load %arg7[%c0_8, %c0_9] : memref<8x128xf32, #tpu.memory_space<vmem>>, vector<8x128xf32>
    tpu.vector_store %arg7[%c0_8, %c0_9], %12 {strides = array<i32>} : memref<8x128xf32, #tpu.memory_space<vmem>>, vector<8x128xf32>,
    %c0_10 = arith.constant 0 : index
    %c0_11 = arith.constant 0 : index
    %14 = vector.load %arg8[%c0_10, %c0_11] : memref<8x128xf32, #tpu.memory_space<vmem>>, vector<8x128xf32>
    %15 = vector.shape_cast %3 : vector<32x128xf32> to vector<4x8x128xf32>
    %cst_12 = arith.constant dense<0.000000e+00> : vector<8x128xf32>
    %16 = vector.multi_reduction <add>, %15, %cst_12 [0] : vector<4x8x128xf32> to vector<8x128xf32>
    %17 = arith.addf %14, %16 : vector<8x128xf32>
    %c0_13 = arith.constant 0 : index
    %c0_14 = arith.constant 0 : index
    %18 = vector.load %arg8[%c0_13, %c0_14] : memref<8x128xf32, #tpu.memory_space<vmem>>, vector<8x128xf32>
    tpu.vector_store %arg8[%c0_13, %c0_14], %17 {strides = array<i32>} : memref<8x128xf32, #tpu.memory_space<vmem>>, vector<8x128xf32>,
    %c0_i32_15 = arith.constant 0 : i32
    %19 = arith.cmpi eq, %arg1, %c0_i32_15 : i32
    %20 = arith.extui %19 : i1 to i32
    %c0_i32_16 = arith.constant 0 : i32
    %21 = arith.cmpi ne, %20, %c0_i32_16 : i32
    scf.if %21 {
      %c0_17 = arith.constant 0 : index
      %c0_18 = arith.constant 0 : index
      %22 = vector.load %arg7[%c0_17, %c0_18] : memref<8x128xf32, #tpu.memory_space<vmem>>, vector<8x128xf32>
      %23 = vector.shape_cast %22 : vector<8x128xf32> to vector<1x8x128xf32>
      %cst_19 = arith.constant dense<0.000000e+00> : vector<1xf32>
      %24 = vector.multi_reduction <add>, %23, %cst_19 [1, 2] : vector<1x8x128xf32> to vector<1xf32>
      %25 = vector.shape_cast %24 : vector<1xf32> to vector<1x1x1xf32>
      %26 = vector.extract %25[0, 0, 0] : f32 from vector<1x1x1xf32>
      %27 = vector.broadcast %26 : f32 to vector<1x1x1xf32>
      %c0_20 = arith.constant 0 : index
      %c0_21 = arith.constant 0 : index
      %c0_22 = arith.constant 0 : index
      %28 = vector.load %arg5[%c0_20, %c0_21, %c0_22] : memref<1x1x1xf32, #tpu.memory_space<vmem>>, vector<1x1x1xf32>
      tpu.vector_store %arg5[%c0_20, %c0_21, %c0_22], %27 {strides = array<i32>} : memref<1x1x1xf32, #tpu.memory_space<vmem>>, vector<1x1x1xf32>,
      %c0_23 = arith.constant 0 : index
      %c0_24 = arith.constant 0 : index
      %29 = vector.load %arg8[%c0_23, %c0_24] : memref<8x128xf32, #tpu.memory_space<vmem>>, vector<8x128xf32>
      %30 = vector.shape_cast %29 : vector<8x128xf32> to vector<1x8x128xf32>
      %cst_25 = arith.constant dense<0.000000e+00> : vector<1xf32>
      %31 = vector.multi_reduction <add>, %30, %cst_25 [1, 2] : vector<1x8x128xf32> to vector<1xf32>
      %32 = vector.shape_cast %31 : vector<1xf32> to vector<1x1x1xf32>
      %33 = vector.extract %32[0, 0, 0] : f32 from vector<1x1x1xf32>
      %34 = vector.broadcast %33 : f32 to vector<1x1x1xf32>
      %c0_26 = arith.constant 0 : index
      %c0_27 = arith.constant 0 : index
      %c0_28 = arith.constant 0 : index
      %35 = vector.load %arg6[%c0_26, %c0_27, %c0_28] : memref<1x1x1xf32, #tpu.memory_space<vmem>>, vector<1x1x1xf32>
      tpu.vector_store %arg6[%c0_26, %c0_27, %c0_28], %34 {strides = array<i32>} : memref<1x1x1xf32, #tpu.memory_space<vmem>>, vector<1x1x1xf32>,
    } else {
    }
    return
  }
  func.func @transform_0(%arg0: i32, %arg1: i32) -> (i32, i32) {
    %c1_i32 = arith.constant 1 : i32
    %0 = arith.muli %arg0, %c1_i32 : i32
    %1 = arith.addi %0, %arg1 : i32
    %c0_i32 = arith.constant 0 : i32
    %2 = arith.minsi %1, %c0_i32 : i32
    %c0_i32_0 = arith.constant 0 : i32
    %c0_i32_1 = arith.constant 0 : i32
    return %2, %c0_i32_0 : i32, i32
  }
  func.func @transform_1(%arg0: i32, %arg1: i32) -> (i32, i32) {
    %c1_i32 = arith.constant 1 : i32
    %0 = arith.muli %arg0, %c1_i32 : i32
    %1 = arith.addi %0, %arg1 : i32
    %c0_i32 = arith.constant 0 : i32
    %2 = arith.minsi %1, %c0_i32 : i32
    %c0_i32_0 = arith.constant 0 : i32
    %c0_i32_1 = arith.constant 0 : i32
    return %2, %c0_i32_0 : i32, i32
  }
  func.func @transform_2(%arg0: i32, %arg1: i32) -> (i32, i32) {
    %c1_i32 = arith.constant 1 : i32
    %0 = arith.muli %arg0, %c1_i32 : i32
    %1 = arith.addi %0, %arg1 : i32
    %c0_i32 = arith.constant 0 : i32
    %2 = arith.minsi %1, %c0_i32 : i32
    %c0_i32_0 = arith.constant 0 : i32
    %c0_i32_1 = arith.constant 0 : i32
    return %2, %c0_i32_0 : i32, i32
  }
  func.func @transform_3(%arg0: i32, %arg1: i32) -> (i32, i32, i32) {
    %c0_i32 = arith.constant 0 : i32
    %c0_i32_0 = arith.constant 0 : i32
    %c0_i32_1 = arith.constant 0 : i32
    return %arg0, %c0_i32, %c0_i32_0 : i32, i32, i32
  }
  func.func @transform_4(%arg0: i32, %arg1: i32) -> (i32, i32, i32) {
    %c0_i32 = arith.constant 0 : i32
    %c0_i32_0 = arith.constant 0 : i32
    %c0_i32_1 = arith.constant 0 : i32
    return %arg0, %c0_i32, %c0_i32_0 : i32, i32, i32
  }
}

</mosaic_0001>

<bundles_post_ra>
// kernel: _weighted_mse_impl.1
= control target key start
LH: loop header
LB: loop body
LE: loop exit
PB: predicated region body
PF: predicated region fallthrough
CT: control target
= control target key end

     0   :  { %10 = vsyncpa [#allocation5], 0  ;;  %s361_s0 = inlined_call_operand.vmem [shape: f32[32,128], index: 0, kind: input, shape index: {}]   ;;  %s362_s1 = inlined_call_operand.vmem [shape: f32[32,128], index: 1, kind: input, shape index: {}]   ;;  %s363_s2 = inlined_call_operand.vmem [shape: f32[32,128], index: 2, kind: input, shape index: {}]   ;;  %s364_s3 = inlined_call_operand.hbm [shape: f32[1,1,1], index: 3, kind: output, shape index: {0}]   ;;  %s365_s4 = inlined_call_operand.hbm [shape: f32[1,1,1], index: 4, kind: output, shape index: {1}]  }
   0x1   :  { %v124_v0 = vld [vmem:[%s361_s0] sm:$0xff]  ;;  %v125_v1 = vld [vmem:[%s361_s0 + $0x8] sm:$0xff]  ;;  %v126_v2 = vld [vmem:[%s361_s0 + $0x10] sm:$0xff] }
   0x2   :  { %v127_v3 = vld [vmem:[%s361_s0 + $0x18] sm:$0xff]  ;;  %v128_v4 = vld [vmem:[%s362_s1] sm:$0xff]  ;;  %v129_v5 = vld [vmem:[%s362_s1 + $0x8] sm:$0xff] }
   0x3   :  { %v130_v6 = vld [vmem:[%s362_s1 + $0x10] sm:$0xff]  ;;  %v131_v7 = vld [vmem:[%s362_s1 + $0x18] sm:$0xff]  ;;  %v132_v8 = vsub.f32 %v124_v0, %v128_v4  ;;  %v120_v9 = vld [vmem:[%s363_s2] sm:$0xff]  ;;  %v133_v10 = vsub.f32 %v125_v1, %v129_v5 }
   0x4   :  { %v134_v11 = vsub.f32 %v126_v2, %v130_v6  ;;  %v135_v12 = vsub.f32 %v127_v3, %v131_v7 }
   0x5   :  { %11 = vsyncpa [#allocation7], 0  ;;  %v121_v13 = vld [vmem:[%s363_s2 + $0x8] sm:$0xff]  ;;  %v122_v14 = vld [vmem:[%s363_s2 + $0x10] sm:$0xff]  ;;  %v136_v15 = vmul.f32 %v132_v8, %v132_v8  ;;  %v137_v16 = vmul.f32 %v133_v10, %v133_v10  ;;  %s191_s14 = sshll.u32 %s364_s3, 4  ;;  %vm170_vm0 = vcmask 0   ;;  %s192_s14 = int_to_ptr.hbm [resolvable:$true] %s191_s14 }
   0x6   :  { %v138_v17 = vmul.f32 %v134_v11, %v134_v11  ;;  %v139_v18 = vmul.f32 %v135_v12, %v135_v12  ;;  %v123_v19 = vld [vmem:[%s363_s2 + $0x18] sm:$0xff]  ;;  %v151_v26 = vadd.f32 %v121_v13, %v120_v9  ;;  %s292_s2 = smov [#allocation4]   ;;  %s293_s16 = smov [#allocation6]  }
   0x7   :  { %v140_v20 = vmul.f32 %v136_v15, %v120_v9  ;;  %v141_v21 = vmul.f32 %v137_v16, %v121_v13  ;;  %s189_s11 = sshll.u32 %s292_s2, 4  ;;  %s200_s17 = sshll.u32 %s293_s16, 4  ;;  %s190_s11 = int_to_ptr.vmem [resolvable:$true] %s189_s11  ;;  %s201_s17 = int_to_ptr.vmem [resolvable:$true] %s200_s17 }
   0x8   :  { %v142_v22 = vmul.f32 %v138_v17, %v122_v14  ;;  %v143_v23 = vmul.f32 %v139_v18, %v123_v19  ;;  %v152_v28 = vadd.f32 %v151_v26, %v122_v14  ;;  %s202_s20 = sshll.u32 %s365_s4, 4  ;;  %s203_s20 = int_to_ptr.hbm [resolvable:$true] %s202_s20 }
   0x9   :  { %v145_v24 = vadd.f32 %v141_v21, %v140_v20 }
   0xa   :  { %v153_v29 = vadd.f32 %v152_v28, %v123_v19 }
   0xb   :  { %v146_v25 = vadd.f32 %v145_v24, %v142_v22 }
   0xd   :  { %v147_v27 = vadd.f32 %v146_v25, %v143_v23 }
   0xf   :  { %160 = vadd.xlane.f32.xlu0 %v147_v27 }
  0x17   :  { %173 = vadd.xlane.f32.xlu0 %v153_v29 }
  0x82   :  { %v161_v30 = vpop.xlane.xlu0 %160 }
  0x83   :  { %v162_v31 = vrot.slane %v161_v30, 4 }
  0x85   :  { %v163_v32 = vadd.f32 %v162_v31, %v161_v30 }
  0x87   :  { %v164_v33 = vrot.slane %v163_v32, 2 }
  0x89   :  { %v165_v34 = vadd.f32 %v164_v33, %v163_v32 }
  0x8a   :  { %v174_v35 = vpop.xlane.xlu0 %173 }
  0x8b   :  { %v175_v36 = vrot.slane %v174_v35, 4  ;;  %v166_v37 = vrot.slane %v165_v34, 1 }
  0x8d   :  { %v176_v38 = vadd.f32 %v175_v36, %v174_v35  ;;  %v167_v39 = vadd.f32 %v166_v37, %v165_v34 }
  0x8f   :  { %v177_v40 = vrot.slane %v176_v38, 2  ;;  %234 = vpush %v167_v39 }
  0x91   :  { %v178_v41 = vadd.f32 %v177_v40, %v176_v38 }
  0x93   :  { %v179_v42 = vrot.slane %v178_v41, 1 }
  0x95   :  { %v180_v43 = vadd.f32 %v179_v42, %v178_v41 }
  0x97   :  { %236 = vpush %v180_v43 }
  0xc0   :  { %s235_s15 = spop %234 }
  0xc1   :  { %v169_v44 = vstv %s235_s15 }
  0xc2   :  { %171 = vst.msk [vmem:[#allocation4] sm:$0x1] %vm170_vm0, %v169_v44 }
  0xc3   :  { %194 = dma.vmem_to_hbm [thread:$0]  %s190_s11, 16, %s192_s14, [#allocation5]  }
  0xc8   :  { %s237_s21 = spop %236 }
  0xc9   :  { %v182_v45 = vstv %s237_s21 }
  0xca   :  { %183 = vst.msk [vmem:[#allocation6] sm:$0x1] %vm170_vm0, %v182_v45 }
  0xcb   :  { %205 = dma.vmem_to_hbm [thread:$0]  %s201_s17, 16, %s203_s20, [#allocation7]  }
  0xcc   :  { %288 = dma.done.wait [#allocation5], 16  }
  0xcd   :  { %289 = vsyncadd [#allocation5], 4294967280 }
  0xce   :  { %290 = dma.done.wait [#allocation7], 16  }
  0xcf   :  { %291 = vsyncadd [#allocation7], 4294967280 }
  0xd0   :  { %214 = vsyncpa [#allocation5], 1 }
  0xd1   :  { %215 = vsyncpa [#allocation7], 1 }

</bundles_post_ra>
